<compile_context>
chip_gen: v7x
topology: tpu7x:2x2x1
jax: 0.10.0
libtpu: 0.0.40
codegen_flags: <defaults>
</compile_context>

<pallas_src>
import functools

import jax
import jax.numpy as jnp
from jax.experimental import pallas as pl
from jax.experimental.pallas import tpu as pltpu


def _actor_kernel(x_ref, w1_ref, b1_ref, w2_ref, b2_ref, w3_ref, b3_ref, o_ref):
    # fc1 + relu: cast the (tb, in_dim) state tile to the weight dtype in VMEM
    # (no wrapper-side pad/convert pass), accumulate in f32 on the MXU.
    x = x_ref[...].astype(w1_ref.dtype)
    h1 = jnp.dot(x, w1_ref[...], preferred_element_type=jnp.float32)
    h1 = jnp.maximum(h1 + b1_ref[...], 0.0)
    # fc2 + relu
    h2 = jnp.dot(h1.astype(w2_ref.dtype), w2_ref[...],
                 preferred_element_type=jnp.float32)
    h2 = jnp.maximum(h2 + b2_ref[...], 0.0)
    # mu + tanh (tanh on the EUP, in f32)
    mu = jnp.dot(h2.astype(w3_ref.dtype), w3_ref[...],
                 preferred_element_type=jnp.float32)
    o_ref[...] = jnp.tanh(mu + b3_ref[...]).astype(o_ref.dtype)


def _round_up(x, m):
    return ((x + m - 1) // m) * m


def prepare_actor_params(w1, b1, w2, b2, w3, b3, *,
                         param_dtype=jnp.bfloat16, lane_mult=128):
    """Pad/cast the weights ONCE (hoisted out of the per-step forward).

    w*: [fan_in, fan_out] (transposed vs torch.nn.Linear); b*: [fan_out] or
    [1, fan_out].  Hidden / output fan_out dims are zero-padded to multiples
    of `lane_mult` (128); the input dim of w1 keeps its natural width.
    Zero padding preserves semantics: padded hidden units stay 0 through ReLU
    and contribute nothing downstream; padded output lanes are sliced off in
    actor_forward.  Biases stay f32 for the f32 epilogue.
    """
    in_dim, fc1_dims = w1.shape
    fc2_dims = w2.shape[1]
    n_actions = w3.shape[1]
    fc1_p = _round_up(fc1_dims, lane_mult)
    fc2_p = _round_up(fc2_dims, lane_mult)
    out_p = _round_up(n_actions, lane_mult)

    def pad_w(w, rows, cols):
        return jnp.pad(
            w, ((0, rows - w.shape[0]), (0, cols - w.shape[1]))
        ).astype(param_dtype)

    def pad_b(b, cols):
        b = jnp.asarray(b).reshape(1, -1)
        return jnp.pad(b, ((0, 0), (0, cols - b.shape[1]))).astype(jnp.float32)

    return (pad_w(w1, in_dim, fc1_p), pad_b(b1, fc1_p),
            pad_w(w2, fc1_p, fc2_p), pad_b(b2, fc2_p),
            pad_w(w3, fc2_p, out_p), pad_b(b3, out_p))


@functools.partial(jax.jit, static_argnames=("n_actions", "block_b"))
def actor_forward(state, params, *, n_actions, block_b=1024):
    """Fused 3-layer MLP actor forward.

    state:  [B, in_dim] float32
    params: output of prepare_actor_params (padded / cast weights & biases)
    Returns [B, n_actions] float32.
    """
    w1p, b1p, w2p, b2p, w3p, b3p = params
    B, in_dim = state.shape
    assert w1p.shape[0] == in_dim, "state feature dim does not match w1"
    fc1_p = w1p.shape[1]
    fc2_p = w2p.shape[1]
    out_p = w3p.shape[1]

    # Batch tile: multiple of 16 (bf16 sublane packing); large enough to
    # amortize ~0.35 us/step grid overhead, capped so the grid has >= 2 steps
    # when the batch allows it (lets "parallel" shard over both v7x TCs).
    block_b = max(16, _round_up(block_b, 16))
    tb = min(block_b, _round_up(B, 16))
    if B > 16:
        tb = min(tb, _round_up((B + 1) // 2, 16))
    b_p = _round_up(B, tb)
    grid = (b_p // tb,)

    # Only the batch axis is padded (cheap, often a no-op); the feature axis
    # keeps its natural width and the f32->bf16 cast happens inside the kernel.
    x = state
    if b_p != B:
        x = jnp.pad(state, ((0, b_p - B), (0, 0)))

    w_bytes = sum(int(a.size) * a.dtype.itemsize for a in params)
    cost = pl.CostEstimate(
        flops=2 * b_p * (in_dim * fc1_p + fc1_p * fc2_p + fc2_p * out_p),
        transcendentals=b_p * out_p,
        bytes_accessed=int(x.size) * x.dtype.itemsize + w_bytes
        + b_p * out_p * w1p.dtype.itemsize,
    )

    out_padded = pl.pallas_call(
        _actor_kernel,
        out_shape=jax.ShapeDtypeStruct((b_p, out_p), w1p.dtype),
        grid_spec=pltpu.PrefetchScalarGridSpec(
            num_scalar_prefetch=0,
            grid=grid,
            in_specs=[
                # state tile: walks the batch axis; natural (unpadded) last dim
                pl.BlockSpec((tb, in_dim), lambda i: (i, 0)),
                # weights / biases: constant index_map -> DMA'd once, resident
                pl.BlockSpec((in_dim, fc1_p), lambda i: (0, 0)),
                pl.BlockSpec((1, fc1_p), lambda i: (0, 0)),
                pl.BlockSpec((fc1_p, fc2_p), lambda i: (0, 0)),
                pl.BlockSpec((1, fc2_p), lambda i: (0, 0)),
                pl.BlockSpec((fc2_p, out_p), lambda i: (0, 0)),
                pl.BlockSpec((1, out_p), lambda i: (0, 0)),
            ],
            out_specs=pl.BlockSpec((tb, out_p), lambda i: (i, 0)),
        ),
        compiler_params=pltpu.CompilerParams(
            dimension_semantics=("parallel",),   # megacore sharding on v7x
            vmem_limit_bytes=32 * 1024 * 1024,
        ),
        cost_estimate=cost,
    )(x, w1p, b1p, w2p, b2p, w3p, b3p)

    # Strip batch / lane padding; return f32 regardless of compute dtype.
    return out_padded[:B, :n_actions].astype(jnp.float32)


def _torch_linear_init(key, fan_in, fan_out):
    """torch.nn.Linear default init: U(-1/sqrt(fan_in), 1/sqrt(fan_in)).
    Returns W [fan_in, fan_out] (transposed vs torch) and b [1, fan_out]."""
    kw, kb = jax.random.split(key)
    bound = 1.0 / jnp.sqrt(jnp.float32(fan_in))
    w = jax.random.uniform(kw, (fan_in, fan_out), jnp.float32, -bound, bound)
    b = jax.random.uniform(kb, (1, fan_out), jnp.float32, -bound, bound)
    return w, b


def _reference_forward(state, w1, b1, w2, b2, w3, b3):
    h1 = jnp.maximum(state @ w1 + b1, 0.0)
    h2 = jnp.maximum(h1 @ w2 + b2, 0.0)
    return jnp.tanh(h2 @ w3 + b3)


if __name__ == "__main__":
    # Small shapes consistent with the module: state dim, two hidden layers,
    # action head (scaled-down analogues of the 400/300 hidden units).
    batch = 4
    input_dim = 16
    fc1_dims = 64
    fc2_dims = 64
    n_actions = 4

    key = jax.random.PRNGKey(0)
    k_state, k1, k2, k3 = jax.random.split(key, 4)

    state = jax.random.normal(k_state, (batch, input_dim), jnp.float32)
    w1, b1 = _torch_linear_init(k1, input_dim, fc1_dims)
    w2, b2 = _torch_linear_init(k2, fc1_dims, fc2_dims)
    w3, b3 = _torch_linear_init(k3, fc2_dims, n_actions)

    ref = _reference_forward(state, w1, b1, w2, b2, w3, b3)

    # 1) f32 params: exact match vs reference (tight tolerance).
    params_f32 = prepare_actor_params(w1, b1, w2, b2, w3, b3,
                                      param_dtype=jnp.float32)
    out_f32 = actor_forward(state, params_f32, n_actions=n_actions)
    out_f32 = jax.block_until_ready(out_f32)
    assert out_f32.shape == (batch, n_actions)
    assert jnp.allclose(out_f32, ref, atol=1e-5, rtol=1e-5), \
        "f32 kernel mismatch vs reference"

    # 2) bf16 params + f32 accumulation / epilogue (production path).
    params_bf16 = prepare_actor_params(w1, b1, w2, b2, w3, b3,
                                       param_dtype=jnp.bfloat16)
    out_bf16 = actor_forward(state, params_bf16, n_actions=n_actions)
    out_bf16 = jax.block_until_ready(out_bf16)
    assert out_bf16.shape == (batch, n_actions)
    assert jnp.allclose(out_bf16, ref, atol=2e-2, rtol=2e-2), \
        "bf16 kernel mismatch vs reference"

    # 3) Multi-step batch grid (ragged batch; >= 2 grid steps for megacore).
    big_batch = 48
    big_state = jax.random.normal(jax.random.PRNGKey(1),
                                  (big_batch, input_dim), jnp.float32)
    big_ref = _reference_forward(big_state, w1, b1, w2, b2, w3, b3)
    big_out = actor_forward(big_state, params_bf16, n_actions=n_actions)
    big_out = jax.block_until_ready(big_out)
    assert big_out.shape == (big_batch, n_actions)
    assert jnp.allclose(big_out, big_ref, atol=2e-2, rtol=2e-2), \
        "tiled bf16 kernel mismatch vs reference"

    # TODO(synk): optimizer step (Adam), set_weights, and checkpoint I/O are
    # host-side utilities outside the forward pass; not implemented as kernels.
    print("KERNEL_OK")
</pallas_src>

<mosaic_0001>
module attributes {stable_mosaic.version = 11 : i64} {
  func.func @_actor_kernel(%arg0: i32, %arg1: memref<16x16xf32, #tpu.memory_space<vmem>>, %arg2: memref<16x128xf32, #tpu.memory_space<vmem>>, %arg3: memref<1x128xf32, #tpu.memory_space<vmem>>, %arg4: memref<128x128xf32, #tpu.memory_space<vmem>>, %arg5: memref<1x128xf32, #tpu.memory_space<vmem>>, %arg6: memref<128x128xf32, #tpu.memory_space<vmem>>, %arg7: memref<1x128xf32, #tpu.memory_space<vmem>>, %arg8: memref<16x128xf32, #tpu.memory_space<vmem>>) attributes {dimension_semantics = [#tpu.dimension_semantics<parallel>], iteration_bounds = array<i64: 1>, scalar_prefetch = 0 : i64, scratch_operands = 0 : i64, tpu.core_type = #tpu.core_type<tc>, window_params = [{transform_indices = @transform_0, window_bounds = array<i64: 16, 16>}, {pipeline_mode = #tpu.pipeline_mode<synchronous>, transform_indices = @transform_1, window_bounds = array<i64: 16, 128>}, {pipeline_mode = #tpu.pipeline_mode<synchronous>, transform_indices = @transform_2, window_bounds = array<i64: 1, 128>}, {pipeline_mode = #tpu.pipeline_mode<synchronous>, transform_indices = @transform_3, window_bounds = array<i64: 128, 128>}, {pipeline_mode = #tpu.pipeline_mode<synchronous>, transform_indices = @transform_4, window_bounds = array<i64: 1, 128>}, {pipeline_mode = #tpu.pipeline_mode<synchronous>, transform_indices = @transform_5, window_bounds = array<i64: 128, 128>}, {pipeline_mode = #tpu.pipeline_mode<synchronous>, transform_indices = @transform_6, window_bounds = array<i64: 1, 128>}, {transform_indices = @transform_7, window_bounds = array<i64: 16, 128>}]} {
    %c0 = arith.constant 0 : index
    %c0_0 = arith.constant 0 : index
    %0 = vector.load %arg1[%c0, %c0_0] : memref<16x16xf32, #tpu.memory_space<vmem>>, vector<16x16xf32>
    %c0_1 = arith.constant 0 : index
    %c0_2 = arith.constant 0 : index
    %1 = vector.load %arg2[%c0_1, %c0_2] : memref<16x128xf32, #tpu.memory_space<vmem>>, vector<16x128xf32>
    %cst = arith.constant dense<0.000000e+00> : vector<16x128xf32>
    %2 = tpu.matmul %0, %1, %cst {dimension_numbers = #tpu.dot_dimension_numbers<[1], [0], [0], [1], [0, 0, 1, 1], [], []>} : vector<16x16xf32>, vector<16x128xf32>, vector<16x128xf32> -> vector<16x128xf32>
    %c0_3 = arith.constant 0 : index
    %c0_4 = arith.constant 0 : index
    %3 = vector.load %arg3[%c0_3, %c0_4] : memref<1x128xf32, #tpu.memory_space<vmem>>, vector<1x128xf32>
    %4 = vector.broadcast %3 : vector<1x128xf32> to vector<16x128xf32>
    %5 = arith.addf %2, %4 : vector<16x128xf32>
    %cst_5 = arith.constant 0.000000e+00 : f32
    %6 = vector.broadcast %cst_5 : f32 to vector<16x128xf32>
    %7 = arith.maximumf %5, %6 : vector<16x128xf32>
    %c0_6 = arith.constant 0 : index
    %c0_7 = arith.constant 0 : index
    %8 = vector.load %arg4[%c0_6, %c0_7] : memref<128x128xf32, #tpu.memory_space<vmem>>, vector<128x128xf32>
    %cst_8 = arith.constant dense<0.000000e+00> : vector<16x128xf32>
    %9 = tpu.matmul %7, %8, %cst_8 {dimension_numbers = #tpu.dot_dimension_numbers<[1], [0], [0], [1], [0, 0, 1, 1], [], []>} : vector<16x128xf32>, vector<128x128xf32>, vector<16x128xf32> -> vector<16x128xf32>
    %c0_9 = arith.constant 0 : index
    %c0_10 = arith.constant 0 : index
    %10 = vector.load %arg5[%c0_9, %c0_10] : memref<1x128xf32, #tpu.memory_space<vmem>>, vector<1x128xf32>
    %11 = vector.broadcast %10 : vector<1x128xf32> to vector<16x128xf32>
    %12 = arith.addf %9, %11 : vector<16x128xf32>
    %cst_11 = arith.constant 0.000000e+00 : f32
    %13 = vector.broadcast %cst_11 : f32 to vector<16x128xf32>
    %14 = arith.maximumf %12, %13 : vector<16x128xf32>
    %c0_12 = arith.constant 0 : index
    %c0_13 = arith.constant 0 : index
    %15 = vector.load %arg6[%c0_12, %c0_13] : memref<128x128xf32, #tpu.memory_space<vmem>>, vector<128x128xf32>
    %cst_14 = arith.constant dense<0.000000e+00> : vector<16x128xf32>
    %16 = tpu.matmul %14, %15, %cst_14 {dimension_numbers = #tpu.dot_dimension_numbers<[1], [0], [0], [1], [0, 0, 1, 1], [], []>} : vector<16x128xf32>, vector<128x128xf32>, vector<16x128xf32> -> vector<16x128xf32>
    %c0_15 = arith.constant 0 : index
    %c0_16 = arith.constant 0 : index
    %17 = vector.load %arg7[%c0_15, %c0_16] : memref<1x128xf32, #tpu.memory_space<vmem>>, vector<1x128xf32>
    %18 = vector.broadcast %17 : vector<1x128xf32> to vector<16x128xf32>
    %19 = arith.addf %16, %18 : vector<16x128xf32>
    %20 = math.tanh %19 : vector<16x128xf32>
    %c0_17 = arith.constant 0 : index
    %c0_18 = arith.constant 0 : index
    %21 = vector.load %arg8[%c0_17, %c0_18] : memref<16x128xf32, #tpu.memory_space<vmem>>, vector<16x128xf32>
    tpu.vector_store %arg8[%c0_17, %c0_18], %20 {strides = array<i32>} : memref<16x128xf32, #tpu.memory_space<vmem>>, vector<16x128xf32>,
    return
  }
  func.func @transform_0(%arg0: i32) -> (i32, i32) {
    %c0_i32 = arith.constant 0 : i32
    %c0_i32_0 = arith.constant 0 : i32
    return %arg0, %c0_i32 : i32, i32
  }
  func.func @transform_1(%arg0: i32) -> (i32, i32) {
    %c0_i32 = arith.constant 0 : i32
    %c0_i32_0 = arith.constant 0 : i32
    %c0_i32_1 = arith.constant 0 : i32
    return %c0_i32, %c0_i32_0 : i32, i32
  }
  func.func @transform_2(%arg0: i32) -> (i32, i32) {
    %c0_i32 = arith.constant 0 : i32
    %c0_i32_0 = arith.constant 0 : i32
    %c0_i32_1 = arith.constant 0 : i32
    return %c0_i32, %c0_i32_0 : i32, i32
  }
  func.func @transform_3(%arg0: i32) -> (i32, i32) {
    %c0_i32 = arith.constant 0 : i32
    %c0_i32_0 = arith.constant 0 : i32
    %c0_i32_1 = arith.constant 0 : i32
    return %c0_i32, %c0_i32_0 : i32, i32
  }
  func.func @transform_4(%arg0: i32) -> (i32, i32) {
    %c0_i32 = arith.constant 0 : i32
    %c0_i32_0 = arith.constant 0 : i32
    %c0_i32_1 = arith.constant 0 : i32
    return %c0_i32, %c0_i32_0 : i32, i32
  }
  func.func @transform_5(%arg0: i32) -> (i32, i32) {
    %c0_i32 = arith.constant 0 : i32
    %c0_i32_0 = arith.constant 0 : i32
    %c0_i32_1 = arith.constant 0 : i32
    return %c0_i32, %c0_i32_0 : i32, i32
  }
  func.func @transform_6(%arg0: i32) -> (i32, i32) {
    %c0_i32 = arith.constant 0 : i32
    %c0_i32_0 = arith.constant 0 : i32
    %c0_i32_1 = arith.constant 0 : i32
    return %c0_i32, %c0_i32_0 : i32, i32
  }
  func.func @transform_7(%arg0: i32) -> (i32, i32) {
    %c0_i32 = arith.constant 0 : i32
    %c0_i32_0 = arith.constant 0 : i32
    return %arg0, %c0_i32 : i32, i32
  }
}

</mosaic_0001>

<bundles_post_ra>
// kernel: actor_forward.1
= control target key start
LH: loop header
LB: loop body
LE: loop exit
PB: predicated region body
PF: predicated region fallthrough
CT: control target
= control target key end

     0   :  { %12 = vsyncpa [#allocation3], 0  ;;  %s700_s0 = inlined_call_operand.vmem [shape: f32[16,16], index: 0, kind: input, shape index: {}]   ;;  %s701_s1 = inlined_call_operand.vmem [shape: f32[16,128], index: 1, kind: input, shape index: {}]   ;;  %s702_s2 = inlined_call_operand.vmem [shape: f32[1,128], index: 2, kind: input, shape index: {}]   ;;  %s703_s3 = inlined_call_operand.hbm [shape: f32[128,128], index: 3, kind: input, shape index: {}]   ;;  %s704_s4 = inlined_call_operand.vmem [shape: f32[1,128], index: 4, kind: input, shape index: {}]   ;;  %s705_s5 = inlined_call_operand.hbm [shape: f32[128,128], index: 5, kind: input, shape index: {}]   ;;  %s706_s6 = inlined_call_operand.vmem [shape: f32[1,128], index: 6, kind: input, shape index: {}]   ;;  %s707_s7 = inlined_call_operand.vmem [shape: f32[16,128], index: 7, kind: output, shape index: {}]  }
   0x1   :  { %13 = vsyncpa [#allocation5], 0  ;;  %s603_s24 = smov [#allocation2]   ;;  %s555_s28 = scalar_lea.hbm %s703_s3, 2048 }
   0x2   :  { %s25_s25 = sshll.u32 %s603_s24, 4  ;;  %p556_p0 = scmp.ne.s32.totalorder %s703_s3, %s555_s28  ;;  %s26_s25 = int_to_ptr.vmem [resolvable:$true] %s25_s25 }
   0x3   :  { %p559_p1 = scmp.lt.u32.totalorder %s555_s28, %s703_s3 }
   0x5   :  { %p561_p2 = pnand %p559_p1, %p556_p0 }
   0x7   :  { %564 = shalt.err (!%p561_p2)
}
   0x8   :  { %s565_s10 = scalar_lea.vmem %s26_s25, 2048  ;;  %p570_p4 = scmp.lt.s32.totalorder %s26_s25, %s26_s25 }
   0x9   :  { %p566_p3 = scmp.ne.s32.totalorder %s26_s25, %s565_s10  ;;  %p571_p5 = scmp.lt.s32.totalorder %s565_s10, %s565_s10 }
   0xb   :  { %p572_p6 = por %p571_p5, %p570_p4 }
   0xd   :  { %p573_p7 = pnand %p572_p6, %p566_p3 }
   0xf   :  { %576 = shalt.err (!%p573_p7)
}
  0x10   :  { %s604_s11 = smov 128   ;;  %s605_s12 = smov 8  }
  0x11   :  { %31 = dma.hbm_to_vmem [thread:$0]  %s703_s3, 2048, %s26_s25, [#allocation3], %s604_s11, %s604_s11, %s605_s12  }
  0x12   :  { %s606_s15 = smov [#allocation4]   ;;  %s577_s19 = scalar_lea.hbm %s705_s5, 2048 }
  0x13   :  { %s39_s16 = sshll.u32 %s606_s15, 4  ;;  %p578_p8 = scmp.ne.s32.totalorder %s705_s5, %s577_s19  ;;  %s40_s16 = int_to_ptr.vmem [resolvable:$true] %s39_s16 }
  0x14   :  { %p581_p9 = scmp.lt.u32.totalorder %s577_s19, %s705_s5 }
  0x16   :  { %p583_p10 = pnand %p581_p9, %p578_p8 }
  0x18   :  { %586 = shalt.err (!%p583_p10)
}
  0x19   :  { %s587_s24 = scalar_lea.vmem %s40_s16, 2048  ;;  %p592_p12 = scmp.lt.s32.totalorder %s40_s16, %s40_s16 }
  0x1a   :  { %p588_p11 = scmp.ne.s32.totalorder %s40_s16, %s587_s24  ;;  %p593_p13 = scmp.lt.s32.totalorder %s587_s24, %s587_s24 }
  0x1c   :  { %p594_p0 = por %p593_p13, %p592_p12 }
  0x1e   :  { %p595_p1 = pnand %p594_p0, %p588_p11 }
  0x20   :  { %598 = shalt.err (!%p595_p1)
}
  0x21   :  { %45 = dma.hbm_to_vmem [thread:$0]  %s705_s5, 2048, %s40_s16, [#allocation5], %s604_s11, %s604_s11, %s605_s12  }
  0x22   :  { %599 = dma.done.wait [#allocation3], 2048  }
  0x23   :  { %600 = vsyncadd [#allocation3], 4294965248 }
  0x24   :  { %601 = dma.done.wait [#allocation5], 2048  }
  0x25   :  { %602 = vsyncadd [#allocation5], 4294965248  ;;  %vm65_vm0 = vcmask 130048   ;;  %v56_v0 = vld [vmem:[%s701_s1] sm:$0xff]  ;;  %v57_v1 = vld [vmem:[%s701_s1 + $0x8] sm:$0xff] }
  0x26   :  { %v54_v2 = vld [vmem:[%s700_s0] sm:$0xff]  ;;  %v479_v3 = vpack.c.bf16 %v57_v1, %v56_v0  ;;  %v150_v5 = vld [vmem:[#allocation2 + $0x8] sm:$0xff]  ;;  %v151_v7 = vld [vmem:[#allocation2 + $0x10] sm:$0xff] }
  0x27   :  { %406 = vmatprep.mubr.msk.f32.mxu0 %vm65_vm0, %v54_v2  ;;  %v149_v4 = vld [vmem:[#allocation2] sm:$0xff]  ;;  %v152_v8 = vld [vmem:[#allocation2 + $0x18] sm:$0xff]  ;;  %v154_v11 = vld [vmem:[#allocation2 + $0x28] sm:$0xff] }
  0x28   :  { %v483_v6 = vpack.c.bf16 %v150_v5, %v149_v4  ;;  %480 = vmatprep.subr.bf16.mxu0 %v479_v3  ;;  %v487_v9 = vpack.c.bf16 %v152_v8, %v151_v7  ;;  %v153_v10 = vld [vmem:[#allocation2 + $0x20] sm:$0xff]  ;;  %v55_v12 = vld [vmem:[%s700_s0 + $0x8] sm:$0xff]  ;;  %v155_v14 = vld [vmem:[#allocation2 + $0x30] sm:$0xff] }
  0x29   :  { %482 = vmatpush3.bf16.msra.mxu0 %v479_v3  ;;  %v491_v13 = vpack.c.bf16 %v154_v11, %v153_v10  ;;  %v156_v15 = vld [vmem:[#allocation2 + $0x38] sm:$0xff]  ;;  %v157_v17 = vld [vmem:[#allocation2 + $0x40] sm:$0xff]  ;;  %v158_v18 = vld [vmem:[#allocation2 + $0x48] sm:$0xff] }
  0x2a   :  { %484 = vmatprep.subr.bf16.mxu1 %v483_v6  ;;  %v495_v16 = vpack.c.bf16 %v156_v15, %v155_v14  ;;  %v499_v19 = vpack.c.bf16 %v158_v18, %v157_v17  ;;  %v159_v20 = vld [vmem:[#allocation2 + $0x50] sm:$0xff]  ;;  %v160_v21 = vld [vmem:[#allocation2 + $0x58] sm:$0xff]  ;;  %v161_v23 = vld [vmem:[#allocation2 + $0x60] sm:$0xff] }
  0x2b   :  { %486 = vmatpush3.bf16.msra.mxu1 %v483_v6  ;;  %v503_v22 = vpack.c.bf16 %v160_v21, %v159_v20  ;;  %v162_v24 = vld [vmem:[#allocation2 + $0x68] sm:$0xff]  ;;  %v163_v26 = vld [vmem:[#allocation2 + $0x70] sm:$0xff]  ;;  %v164_v27 = vld [vmem:[#allocation2 + $0x78] sm:$0xff] }
  0x2c   :  { %488 = vmatprep.subr.bf16.mxu1 %v487_v9  ;;  %407 = vmatmul.mubr.msk.f32.vlgmr.msra.gmra.mrb[0].mxu0 %vm65_vm0, %v55_v12  ;;  %v507_v25 = vpack.c.bf16 %v162_v24, %v161_v23  ;;  %v511_v28 = vpack.c.bf16 %v164_v27, %v163_v26  ;;  %v249_v29 = vld [vmem:[#allocation4] sm:$0xff]  ;;  %v250_v30 = vld [vmem:[#allocation4 + $0x8] sm:$0xff]  ;;  %v251_v31 = vld [vmem:[#allocation4 + $0x10] sm:$0xff] }
  0x2d   :  { %v515_v32 = vpack.c.bf16 %v250_v30, %v249_v29  ;;  %v252_v33 = vld [vmem:[#allocation4 + $0x18] sm:$0xff]  ;;  %v253_v35 = vld [vmem:[#allocation4 + $0x20] sm:$0xff]  ;;  %v254_v36 = vld [vmem:[#allocation4 + $0x28] sm:$0xff] }
  0x2e   :  { %v519_v34 = vpack.c.bf16 %v252_v33, %v251_v31  ;;  %v523_v37 = vpack.c.bf16 %v254_v36, %v253_v35  ;;  %v255_v38 = vld [vmem:[#allocation4 + $0x30] sm:$0xff]  ;;  %v256_v39 = vld [vmem:[#allocation4 + $0x38] sm:$0xff]  ;;  %v257_v41 = vld [vmem:[#allocation4 + $0x40] sm:$0xff] }
  0x2f   :  { %490 = vmatpush3.bf16.msra.mxu1 %v487_v9  ;;  %516 = vmatprep.subr.bf16.mxu0 %v515_v32  ;;  %v527_v40 = vpack.c.bf16 %v256_v39, %v255_v38  ;;  %v258_v42 = vld [vmem:[#allocation4 + $0x48] sm:$0xff]  ;;  %v259_v44 = vld [vmem:[#allocation4 + $0x50] sm:$0xff]  ;;  %v260_v45 = vld [vmem:[#allocation4 + $0x58] sm:$0xff] }
  0x30   :  { %492 = vmatprep.subr.bf16.mxu1 %v491_v13  ;;  %518 = vmatpush3.bf16.msra.mxu0 %v515_v32  ;;  %v531_v43 = vpack.c.bf16 %v258_v42, %v257_v41  ;;  %v535_v46 = vpack.c.bf16 %v260_v45, %v259_v44  ;;  %v261_v47 = vld [vmem:[#allocation4 + $0x60] sm:$0xff]  ;;  %v262_v48 = vld [vmem:[#allocation4 + $0x68] sm:$0xff]  ;;  %v263_v57 = vld [vmem:[#allocation4 + $0x70] sm:$0xff] }
  0x31   :  { %520 = vmatprep.subr.bf16.mxu0 %v519_v34  ;;  %v539_v49 = vpack.c.bf16 %v262_v48, %v261_v47  ;;  %v357_v50 = vld [vmem:[%s702_s2] ss:$0 sm:$0xff]  ;;  %v264_v58 = vld [vmem:[#allocation4 + $0x78] sm:$0xff] }
  0x32   :  { %v543_v59 = vpack.c.bf16 %v264_v58, %v263_v57  ;;  %v360_v60 = vld [vmem:[%s704_s4] ss:$0 sm:$0xff] }
  0x33   :  { %494 = vmatpush3.bf16.msra.mxu1 %v491_v13  ;;  %v361_v3 = vld [vmem:[%s706_s6] ss:$0 sm:$0xff] }
  0x34   :  { %496 = vmatprep.subr.bf16.mxu1 %v495_v16  ;;  %522 = vmatpush3.bf16.msra.mxu0 %v519_v34 }
  0x35   :  { %524 = vmatprep.subr.bf16.mxu0 %v523_v37 }
  0x37   :  { %498 = vmatpush3.bf16.msra.mxu1 %v495_v16 }
  0x38   :  { %500 = vmatprep.subr.bf16.mxu1 %v499_v19  ;;  %526 = vmatpush3.bf16.msra.mxu0 %v523_v37 }
  0x39   :  { %528 = vmatprep.subr.bf16.mxu0 %v527_v40 }
  0x3b   :  { %502 = vmatpush3.bf16.msra.mxu1 %v499_v19 }
  0x3c   :  { %504 = vmatprep.subr.bf16.mxu1 %v503_v22  ;;  %530 = vmatpush3.bf16.msra.mxu0 %v527_v40 }
  0x3d   :  { %532 = vmatprep.subr.bf16.mxu0 %v531_v43 }
  0x3f   :  { %506 = vmatpush3.bf16.msra.mxu1 %v503_v22 }
  0x40   :  { %508 = vmatprep.subr.bf16.mxu1 %v507_v25  ;;  %534 = vmatpush3.bf16.msra.mxu0 %v531_v43 }
  0x41   :  { %536 = vmatprep.subr.bf16.mxu0 %v535_v46 }
  0x43   :  { %510 = vmatpush3.bf16.msra.mxu1 %v507_v25 }
  0x44   :  { %512 = vmatprep.subr.bf16.mxu1 %v511_v28  ;;  %538 = vmatpush3.bf16.msra.mxu0 %v535_v46 }
  0x45   :  { %540 = vmatprep.subr.bf16.mxu0 %v539_v49 }
  0x47   :  { %514 = vmatpush3.bf16.msra.mxu1 %v511_v28 }
  0x48   :  { %542 = vmatpush3.bf16.msra.mxu0 %v539_v49 }
  0x49   :  { %544 = vmatprep.subr.bf16.mxu0 %v543_v59 }
  0x4c   :  { %546 = vmatpush3.bf16.msra.mxu0 %v543_v59 }
  0xff   :  { %v408_v51 = vpop.f32.mrb[0].mxu0 }
 0x100   :  { %v144_v52 = vadd.f32 %v408_v51, %v357_v50  ;;  %v138_v53 = vpop.f32.mrb[1].mxu0 }
 0x101   :  { %v139_v54 = vadd.f32 %v357_v50, %v138_v53 }
 0x102   :  { %v148_v56 = vmax.f32 %v144_v52, 0.0 }
 0x103   :  { %v147_v55 = vmax.f32 %v139_v54, 0.0 }
 0x105   :  { %441 = vmatprep.mubr.f32.mxu1 %v147_v55 }
 0x106   :  { %442 = vmatmul.mubr.f32.vlgmr.msra.gmra.mrb[0].mxu1 %v148_v56 }
 0x1d9   :  { %v443_v61 = vpop.f32.mrb[0].mxu1 }
 0x1da   :  { %v244_v62 = vadd.f32 %v443_v61, %v360_v60  ;;  %v238_v63 = vpop.f32.mrb[1].mxu1 }
 0x1db   :  { %v239_v0 = vadd.f32 %v360_v60, %v238_v63 }
 0x1dc   :  { %v248_v2 = vmax.f32 %v244_v62, 0.0 }
 0x1dd   :  { %v247_v1 = vmax.f32 %v239_v0, 0.0 }
 0x1df   :  { %476 = vmatprep.mubr.f32.mxu0 %v247_v1 }
 0x1e0   :  { %477 = vmatmul.mubr.f32.vlgmr.msra.gmra.mrb[2].mxu0 %v248_v2 }
 0x2b3   :  { %v478_v4 = vpop.f32.mrb[2].mxu0 }
 0x2b4   :  { %v344_v5 = vadd.f32 %v478_v4, %v361_v3  ;;  %v338_v6 = vpop.f32.mrb[3].mxu0 }
 0x2b5   :  { %v339_v7 = vadd.f32 %v361_v3, %v338_v6 }
 0x2b6   :  { %551 = vtanh.f32 %v344_v5 }
 0x2b7   :  { %553 = vtanh.f32 %v339_v7 }
 0x2c0   :  { %v552_v8 = vpop.eup %551 }
 0x2c1   :  { %v554_v9 = vpop.eup %553  ;;  %350 = vst [vmem:[%s707_s7 + $0x8] sm:$0xff] %v552_v8 }
 0x2c2   :  { %349 = vst [vmem:[%s707_s7] sm:$0xff] %v554_v9 }
 0x2c3   :  { %355 = vsyncpa [#allocation3], 1 }
 0x2c4   :  { %356 = vsyncpa [#allocation5], 1 }

</bundles_post_ra>
